<compile_context>
chip_gen: v5e
topology: v5e:2x2
jax: 0.10.0
libtpu: 0.0.40
codegen_flags: <defaults>
</compile_context>

<pallas_src>
import functools

import jax
import jax.numpy as jnp
from jax.experimental import pallas as pl
from jax.experimental.pallas import tpu as pltpu


def _round_up(x, m):
    return ((x + m - 1) // m) * m


def _avgpool_kernel_single(x_ref, o_ref, *, inv_hw):
    # One reduction step: x_ref is (rt, hw); reduce lanes directly, no scratch.
    s = jnp.sum(x_ref[...].astype(jnp.float32), axis=-1, keepdims=True)
    o_ref[...] = (s * inv_hw).astype(o_ref.dtype)


def _avgpool_kernel_multi(x_ref, o_ref, acc_ref, *, inv_hw, hw, tk, needs_mask):
    # x_ref: (rt, tk) tile; o_ref: (rt, 1); acc_ref: (rt, 128) f32 (resident).
    k = pl.program_id(1)

    @pl.when(k == 0)
    def _init():
        acc_ref[...] = jnp.zeros_like(acc_ref)

    xf = x_ref[...].astype(jnp.float32)
    if needs_mask:
        # hw % tk != 0: the ragged last k tile's out-of-bounds lanes hold
        # undefined VMEM contents -> zero them before accumulating. For the
        # non-last tiles the predicate is all-true; one vselect per input vreg
        # is fully hidden under the HBM stream.
        lane = jax.lax.broadcasted_iota(jnp.int32, xf.shape, 1)
        xf = jnp.where(k * tk + lane < hw, xf, 0.0)

    # Fold the tk/128 lane-aligned 128-wide static slices (pure VPU, no
    # relayout) into a register-resident partial; single acc update per step.
    n_chunks = tk // 128
    partial = xf[:, 0:128]
    for s in range(1, n_chunks):
        partial = partial + xf[:, s * 128:(s + 1) * 128]
    acc_ref[...] += partial

    @pl.when(k == pl.num_programs(1) - 1)
    def _finalize():
        total = jnp.sum(acc_ref[...], axis=-1, keepdims=True)  # 128-lane XLU reduce
        o_ref[...] = (total * inv_hw).astype(o_ref.dtype)


def avg_pool(x, *, tk_max=2048, rt_max=256):
    """Global average pool. x: (N, C, H, W) -> (N, C)."""
    n, c, h, w = x.shape
    hw = h * w
    rows = n * c
    x2 = x.reshape(rows, hw)          # contiguous dim-merge; no data movement

    itemsize = jnp.dtype(x.dtype).itemsize
    # sublane alignment: 8 rows for 4-byte dtypes, 16 for bf16, 32 for 1-byte
    row_align = 8 * max(1, 4 // max(1, itemsize))

    # Sanitize caps so caller values can never violate the (8,128) rule.
    tk_max = max(128, (int(tk_max) // 128) * 128)
    rt_max = max(row_align, (int(rt_max) // row_align) * row_align)

    # --- row (sublane) tile -------------------------------------------------
    rt = min(rt_max, _round_up(rows, row_align))
    if rt >= rows:
        rt = rows  # block dim == full array dim -> exempt from 8-multiple rule
        if rows > row_align:
            # Keep >= 2 tiles on the "parallel" row axis so both v7x
            # TensorCores get work (harmless on 1-TC v5e/v6e: rows is small
            # whenever this branch fires).
            rt = _round_up(pl.cdiv(rows, 2), row_align)
    num_row_tiles = pl.cdiv(rows, rt)

    # --- lane (HW) tiling and kernel selection --------------------------------
    if hw <= tk_max:
        # Single reduction step: full-hw block (exempt from 128-multiple rule),
        # no padding, no mask, no scratch accumulator.
        grid = (num_row_tiles,)
        kernel = functools.partial(_avgpool_kernel_single, inv_hw=1.0 / float(hw))
        in_specs = [pl.BlockSpec((rt, hw), lambda i: (i, 0))]
        out_specs = pl.BlockSpec((rt, 1), lambda i: (i, 0))
        scratch_shapes = []
        dim_sem = ("parallel",)
    else:
        tk = tk_max
        # VMEM budget guard for triple buffering (only trips for unusual caps).
        while tk > 512 and 3 * rt * tk * itemsize > 24 * 1024 * 1024:
            tk //= 2
        tk = max(128, (tk // 128) * 128)
        num_k = pl.cdiv(hw, tk)
        needs_mask = (hw % tk) != 0
        grid = (num_row_tiles, num_k)
        kernel = functools.partial(
            _avgpool_kernel_multi,
            inv_hw=1.0 / float(hw), hw=hw, tk=tk, needs_mask=needs_mask)
        in_specs = [pl.BlockSpec((rt, tk), lambda i, k: (i, k),
                                 pipeline_mode=pl.Buffered(3))]
        # output block index constant over k -> accumulator stays resident
        out_specs = pl.BlockSpec((rt, 1), lambda i, k: (i, 0))
        scratch_shapes = [pltpu.VMEM((rt, 128), jnp.float32)]
        dim_sem = ("parallel", "arbitrary")

    out = pl.pallas_call(
        kernel,
        out_shape=jax.ShapeDtypeStruct((rows, 1), x.dtype),
        grid_spec=pltpu.PrefetchScalarGridSpec(
            num_scalar_prefetch=0,
            grid=grid,
            in_specs=in_specs,
            out_specs=out_specs,
            scratch_shapes=scratch_shapes,
        ),
        compiler_params=pltpu.CompilerParams(
            dimension_semantics=dim_sem,
            vmem_limit_bytes=48 * 1024 * 1024,
        ),
    )(x2)

    return out[:, 0].reshape(n, c)


if __name__ == "__main__":
    key = jax.random.PRNGKey(0)

    # 1) Small case from the spec: hits the single-step (tk == hw) path.
    x = jax.random.normal(key, (2, 4, 16, 16), dtype=jnp.float32)
    out = jax.block_until_ready(avg_pool(x))
    ref = jnp.mean(x.reshape(x.shape[0], x.shape[1], -1), axis=2)
    assert out.shape == (2, 4), out.shape
    assert jnp.allclose(out, ref, atol=1e-5, rtol=1e-5), "mismatch (single-step path)"

    # 2) Ragged case: hits the multi-step path (k tiling, lane mask on the last
    #    k tile, ragged last row tile, Buffered(3) input pipeline).
    x2 = jax.random.normal(jax.random.PRNGKey(1), (3, 5, 48, 48), dtype=jnp.float32)
    out2 = jax.block_until_ready(avg_pool(x2))
    ref2 = jnp.mean(x2.reshape(x2.shape[0], x2.shape[1], -1), axis=2)
    assert out2.shape == (3, 5), out2.shape
    assert jnp.allclose(out2, ref2, atol=1e-5, rtol=1e-5), "mismatch (multi-step path)"

    print("KERNEL_OK")
</pallas_src>

<mosaic_0001>
module attributes {stable_mosaic.version = 11 : i64} {
  func.func @_avgpool_kernel_single(%arg0: i32, %arg1: memref<8x256xf32, #tpu.memory_space<vmem>>, %arg2: memref<8x1xf32, #tpu.memory_space<vmem>>) attributes {dimension_semantics = [#tpu.dimension_semantics<parallel>], iteration_bounds = array<i64: 1>, scalar_prefetch = 0 : i64, scratch_operands = 0 : i64, tpu.core_type = #tpu.core_type<tc>, window_params = [{transform_indices = @transform_0, window_bounds = array<i64: 8, 256>}, {transform_indices = @transform_1, window_bounds = array<i64: 8, 1>}]} {
    %c0 = arith.constant 0 : index
    %c0_0 = arith.constant 0 : index
    %0 = vector.load %arg1[%c0, %c0_0] : memref<8x256xf32, #tpu.memory_space<vmem>>, vector<8x256xf32>
    %cst = arith.constant dense<0.000000e+00> : vector<8xf32>
    %1 = vector.multi_reduction <add>, %0, %cst [1] : vector<8x256xf32> to vector<8xf32>
    %2 = vector.shape_cast %1 : vector<8xf32> to vector<8x1xf32>
    %cst_1 = arith.constant 3.906250e-03 : f32
    %3 = vector.broadcast %cst_1 : f32 to vector<8x1xf32>
    %4 = arith.mulf %2, %3 : vector<8x1xf32>
    %c0_2 = arith.constant 0 : index
    %c0_3 = arith.constant 0 : index
    %5 = vector.load %arg2[%c0_2, %c0_3] : memref<8x1xf32, #tpu.memory_space<vmem>>, vector<8x1xf32>
    tpu.vector_store %arg2[%c0_2, %c0_3], %4 {strides = array<i32>} : memref<8x1xf32, #tpu.memory_space<vmem>>, vector<8x1xf32>,
    return
  }
  func.func @transform_0(%arg0: i32) -> (i32, i32) {
    %c0_i32 = arith.constant 0 : i32
    %c0_i32_0 = arith.constant 0 : i32
    return %arg0, %c0_i32 : i32, i32
  }
  func.func @transform_1(%arg0: i32) -> (i32, i32) {
    %c0_i32 = arith.constant 0 : i32
    %c0_i32_0 = arith.constant 0 : i32
    return %arg0, %c0_i32 : i32, i32
  }
}

</mosaic_0001>

<bundles_post_ra>
// kernel: tpu_custom_call.1
= control target key start
LH: loop header
LB: loop body
LE: loop exit
PB: predicated region body
PF: predicated region fallthrough
CT: control target
= control target key end

     0   :  { %6 = vsyncpa [#allocation3], 0  ;;  %s62_s9 = smov [#allocation2]   ;;  %s79_s0 = inlined_call_operand.hbm [shape: f32[8,256], index: 0, kind: input, shape index: {}]   ;;  %s80_s1 = inlined_call_operand.vmem [shape: f32[8,1], index: 1, kind: output, shape index: {}]  }
   0x1   :  { %s12_s8 = sshll.u32 %s79_s0, 4  ;;  %s14_s10 = sshll.u32 %s62_s9, 4  ;;  %s13_s8 = int_to_ptr.hbm [resolvable:$true] %s12_s8  ;;  %s15_s10 = int_to_ptr.vmem [resolvable:$true] %s14_s10 }
   0x2   :  { %17 = dma.hbm_to_vmem [thread:$0]  %s13_s8, 256, %s15_s10, [#allocation3]  }
   0x3   :  { %60 = dma.done.wait [#allocation3], 256  }
   0x4   :  { %61 = vsyncadd [#allocation3], 4294967040  ;;  %v22_v0 = vld [vmem:[#allocation2] sm:$0xff]  ;;  %v23_v1 = vld [vmem:[#allocation2 + $0x8] sm:$0xff]  ;;  %vm28_vm0 = vcmask 7168  }
   0x5   :  { %v24_v2 = vadd.f32 %v23_v1, %v22_v0 }
   0x7   :  { %25 = vadd.xlane.f32.xlu0 %v24_v2 }
  0x7a   :  { %v26_v3 = vpop.xlane.xlu0 %25 }
  0x7b   :  { %v27_v4 = vmul.f32 0.00390625, %v26_v3 }
  0x7d   :  { %29 = vst.msk [vmem:[%s80_s1] sm:$0xff] %vm28_vm0, %v27_v4 }
  0x7e   :  { %34 = vsyncpa [#allocation3], 1 }

</bundles_post_ra>
